<compile_context>
chip_gen: v7x
topology: tpu7x:2x2x1
jax: 0.10.0
libtpu: 0.0.40
codegen_flags: <defaults>
</compile_context>

<pallas_src>
import jax
import jax.numpy as jnp
from jax import lax
from jax.experimental import pallas as pl
from jax.experimental.pallas import tpu as pltpu


def _make_rnn_kernel(seq_len, t_chunk, unroll):
    """Builds the recurrence kernel with static seq_len / chunk / unroll baked in."""

    def kernel(x_ref, w1t_ref, w2t_ref, b_ref, hseq_ref, h_scr):
        # Grid = (batch_blocks [parallel], time_chunks [arbitrary]).
        c = pl.program_id(1)

        # h_0 = 0 at the start of every batch block's time sweep
        # (the PyTorch module always starts the recurrence from zeros).
        @pl.when(c == 0)
        def _():
            h_scr[...] = jnp.zeros_like(h_scr)

        b_blk, hidden = h_scr.shape
        w1t = w1t_ref[...]                                    # (I, H) resident
        w2t = w2t_ref[...]                                    # (H, H) resident
        # Hoist the bias broadcast out of the loop (no CSE of broadcast_in_dim).
        bias = jnp.broadcast_to(b_ref[...], (b_blk, hidden))  # (b_blk, H) f32
        # Number of in-range timesteps in this chunk (tail chunks are padded).
        valid = seq_len - c * t_chunk

        def step(t, h):
            # Input projection: independent of h -> off the serial critical path.
            xp = jnp.dot(x_ref[t].astype(jnp.float32), w1t,
                         preferred_element_type=jnp.float32) + bias
            h_new = jnp.tanh(
                xp + jnp.dot(h, w2t, preferred_element_type=jnp.float32))
            hseq_ref[t] = h_new.astype(hseq_ref.dtype)
            # Masked tail: padded (OOB) timesteps must not touch the carry.
            return jnp.where(t < valid, h_new, h)

        h_scr[...] = lax.fori_loop(0, t_chunk, step, h_scr[...], unroll=unroll)

    return kernel


def _rnn_forward_impl(x, w1, b1, w2, b2):
    """x: (S, B, I); w1: (H, I); b1: (H,); w2: (H, H); b2: (H,)."""
    S, B, I = x.shape
    H = w1.shape[0]

    w1t = jnp.transpose(w1).astype(jnp.float32)          # (I, H)
    w2t = jnp.transpose(w2).astype(jnp.float32)          # (H, H)
    bias = (b1 + b2).astype(jnp.float32).reshape(1, H)   # folded bias

    # v7x megacore: split batch across the two TensorCores only when each half
    # still fills >= 8 sublanes (B % 16 == 0).  Moot at B=2; no gain on v5e/v6e.
    nb = 2 if (B % 16 == 0 and B >= 16) else 1
    b_blk = B // nb

    # Time-chunk size from an explicit VMEM budget (safe for v7x's 64 MiB/TC).
    # x block and h_seq block are double-buffered by the pipeline.
    block_budget = 12 * 1024 * 1024
    per_t_bytes = 2 * (b_blk * I + b_blk * H) * 4
    t_chunk = int(max(1, min(S, block_budget // per_t_bytes, 512)))
    nt = pl.cdiv(S, t_chunk)

    # Cap the unroll once H is large enough that a resident (H, H) weight plus
    # long live ranges would start spilling.
    unroll = True if (H < 128 and t_chunk <= 32) else min(t_chunk, 8)

    # Single-buffer the constant weight tiles once double-buffering them costs
    # real VMEM (their index_map is constant, they are never re-fetched anyway).
    const_kwargs = {}
    if 2 * H * H * 4 >= (4 << 20):
        const_kwargs["pipeline_mode"] = pl.Buffered(1)

    weight_bytes = (I * H + H * H + H) * 4
    w_bufs = 1 if const_kwargs else 2
    est_vmem = (per_t_bytes * t_chunk + w_bufs * weight_bytes
                + b_blk * H * 4 + (1 << 20))
    vmem_limit = int(min(64 * 1024 * 1024,
                         max(32 * 1024 * 1024, 2 * est_vmem)))

    grid_spec = pltpu.PrefetchScalarGridSpec(
        num_scalar_prefetch=0,
        grid=(nb, nt),
        in_specs=[
            pl.BlockSpec((t_chunk, b_blk, I), lambda b, c: (c, b, 0)),   # x chunk
            pl.BlockSpec((I, H), lambda b, c: (0, 0), **const_kwargs),   # W1^T
            pl.BlockSpec((H, H), lambda b, c: (0, 0), **const_kwargs),   # W2^T
            pl.BlockSpec((1, H), lambda b, c: (0, 0), **const_kwargs),   # b1+b2
        ],
        out_specs=pl.BlockSpec((t_chunk, b_blk, H), lambda b, c: (c, b, 0)),
        scratch_shapes=[pltpu.VMEM((b_blk, H), jnp.float32)],            # h carry
    )

    cost = pl.CostEstimate(
        flops=2 * S * B * H * H + 2 * S * B * I * H,
        transcendentals=S * B * H,
        bytes_accessed=4 * (S * B * I + I * H + H * H + H + S * B * H),
    )

    h_seq = pl.pallas_call(
        _make_rnn_kernel(S, t_chunk, unroll),
        grid_spec=grid_spec,
        out_shape=jax.ShapeDtypeStruct((S, B, H), x.dtype),
        compiler_params=pltpu.CompilerParams(
            dimension_semantics=("parallel", "arbitrary"),
            vmem_limit_bytes=vmem_limit,
        ),
        cost_estimate=cost,
    )(x, w1t, w2t, bias)

    h_last = h_seq[-1:]   # (1, B, H) — free XLA slice, no extra kernel output
    return h_seq, h_last


rnn_forward = jax.jit(_rnn_forward_impl)


def rnn_reference(x, w1, b1, w2, b2):
    """Pure-JAX reference mirroring the PyTorch loop."""
    S, B, I = x.shape
    H = w1.shape[0]
    h = jnp.zeros((B, H), dtype=jnp.float32)
    outs = []
    for t in range(S):
        h = jnp.tanh(x[t].astype(jnp.float32) @ w1.T + b1 + h @ w2.T + b2)
        outs.append(h)
    h_seq = jnp.stack(outs, axis=0).astype(x.dtype)
    return h_seq, h_seq[-1:].astype(x.dtype)


if __name__ == "__main__":
    # Small, module-consistent shapes: seq=8, batch=2, input_size=4, hidden=32
    S, B, I, H = 8, 2, 4, 32

    key = jax.random.PRNGKey(0)
    kx, k1, k2, k3, k4 = jax.random.split(key, 5)

    # Deterministic parameter init (PyTorch nn.Linear-style uniform bounds).
    bound1 = 1.0 / (I ** 0.5)
    bound2 = 1.0 / (H ** 0.5)
    w1 = jax.random.uniform(k1, (H, I), jnp.float32, -bound1, bound1)
    b1 = jax.random.uniform(k2, (H,),   jnp.float32, -bound1, bound1)
    w2 = jax.random.uniform(k3, (H, H), jnp.float32, -bound2, bound2)
    b2 = jax.random.uniform(k4, (H,),   jnp.float32, -bound2, bound2)

    x = jax.random.normal(kx, (S, B, I), jnp.float32)

    h_seq, h_last = rnn_forward(x, w1, b1, w2, b2)
    jax.block_until_ready((h_seq, h_last))

    h_seq_ref, h_last_ref = rnn_reference(x, w1, b1, w2, b2)
    assert h_seq.shape == (S, B, H)
    assert h_last.shape == (1, B, H)
    assert jnp.allclose(h_seq, h_seq_ref, atol=1e-5, rtol=1e-5)
    assert jnp.allclose(h_last, h_last_ref, atol=1e-5, rtol=1e-5)

    print("KERNEL_OK")
</pallas_src>

<mosaic_0001>
module attributes {stable_mosaic.version = 11 : i64} {
  func.func @kernel(%arg0: i32, %arg1: i32, %arg2: memref<8x2x4xf32, #tpu.memory_space<vmem>>, %arg3: memref<4x32xf32, #tpu.memory_space<vmem>>, %arg4: memref<32x32xf32, #tpu.memory_space<vmem>>, %arg5: memref<1x32xf32, #tpu.memory_space<vmem>>, %arg6: memref<8x2x32xf32, #tpu.memory_space<vmem>>, %arg7: memref<2x32xf32, #tpu.memory_space<vmem>>) attributes {dimension_semantics = [#tpu.dimension_semantics<parallel>, #tpu.dimension_semantics<arbitrary>], iteration_bounds = array<i64: 1, 1>, scalar_prefetch = 0 : i64, scratch_operands = 1 : i64, tpu.core_type = #tpu.core_type<tc>, window_params = [{transform_indices = @transform_0, window_bounds = array<i64: 8, 2, 4>}, {pipeline_mode = #tpu.pipeline_mode<synchronous>, transform_indices = @transform_1, window_bounds = array<i64: 4, 32>}, {pipeline_mode = #tpu.pipeline_mode<synchronous>, transform_indices = @transform_2, window_bounds = array<i64: 32, 32>}, {pipeline_mode = #tpu.pipeline_mode<synchronous>, transform_indices = @transform_3, window_bounds = array<i64: 1, 32>}, {transform_indices = @transform_4, window_bounds = array<i64: 8, 2, 32>}]} {
    %c0_i32 = arith.constant 0 : i32
    %0 = arith.cmpi eq, %arg1, %c0_i32 : i32
    %1 = arith.extui %0 : i1 to i32
    %c0_i32_0 = arith.constant 0 : i32
    %2 = arith.cmpi ne, %1, %c0_i32_0 : i32
    scf.if %2 {
      %cst_60 = arith.constant 0.000000e+00 : f32
      %124 = vector.broadcast %cst_60 : f32 to vector<2x32xf32>
      %c0_61 = arith.constant 0 : index
      %c0_62 = arith.constant 0 : index
      %125 = vector.load %arg7[%c0_61, %c0_62] : memref<2x32xf32, #tpu.memory_space<vmem>>, vector<2x32xf32>
      tpu.vector_store %arg7[%c0_61, %c0_62], %124 {strides = array<i32>} : memref<2x32xf32, #tpu.memory_space<vmem>>, vector<2x32xf32>,
    } else {
    }
    %c0 = arith.constant 0 : index
    %c0_1 = arith.constant 0 : index
    %3 = vector.load %arg3[%c0, %c0_1] : memref<4x32xf32, #tpu.memory_space<vmem>>, vector<4x32xf32>
    %c0_2 = arith.constant 0 : index
    %c0_3 = arith.constant 0 : index
    %4 = vector.load %arg4[%c0_2, %c0_3] : memref<32x32xf32, #tpu.memory_space<vmem>>, vector<32x32xf32>
    %c0_4 = arith.constant 0 : index
    %c0_5 = arith.constant 0 : index
    %5 = vector.load %arg5[%c0_4, %c0_5] : memref<1x32xf32, #tpu.memory_space<vmem>>, vector<1x32xf32>
    %6 = vector.shape_cast %5 : vector<1x32xf32> to vector<1x32xf32>
    %7 = vector.broadcast %6 : vector<1x32xf32> to vector<2x32xf32>
    %c8_i32 = arith.constant 8 : i32
    %8 = arith.muli %arg1, %c8_i32 : i32
    %c8_i32_6 = arith.constant 8 : i32
    %9 = arith.subi %c8_i32_6, %8 : i32
    %c0_7 = arith.constant 0 : index
    %c0_8 = arith.constant 0 : index
    %10 = vector.load %arg7[%c0_7, %c0_8] : memref<2x32xf32, #tpu.memory_space<vmem>>, vector<2x32xf32>
    %c0_i32_9 = arith.constant 0 : i32
    %11 = arith.index_cast %c0_i32_9 : i32 to index
    %c0_10 = arith.constant 0 : index
    %c0_11 = arith.constant 0 : index
    %12 = vector.load %arg2[%11, %c0_10, %c0_11] : memref<8x2x4xf32, #tpu.memory_space<vmem>>, vector<1x2x4xf32>
    %13 = vector.shape_cast %12 : vector<1x2x4xf32> to vector<2x4xf32>
    %cst = arith.constant dense<0.000000e+00> : vector<2x32xf32>
    %14 = tpu.matmul %13, %3, %cst {dimension_numbers = #tpu.dot_dimension_numbers<[1], [0], [0], [1], [0, 0, 1, 1], [], []>} : vector<2x4xf32>, vector<4x32xf32>, vector<2x32xf32> -> vector<2x32xf32>
    %15 = arith.addf %14, %7 : vector<2x32xf32>
    %cst_12 = arith.constant dense<0.000000e+00> : vector<2x32xf32>
    %16 = tpu.matmul %10, %4, %cst_12 {dimension_numbers = #tpu.dot_dimension_numbers<[1], [0], [0], [1], [0, 0, 1, 1], [], []>} : vector<2x32xf32>, vector<32x32xf32>, vector<2x32xf32> -> vector<2x32xf32>
    %17 = arith.addf %15, %16 : vector<2x32xf32>
    %18 = math.tanh %17 : vector<2x32xf32>
    %19 = arith.index_cast %c0_i32_9 : i32 to index
    %c0_13 = arith.constant 0 : index
    %c0_14 = arith.constant 0 : index
    %20 = vector.load %arg6[%19, %c0_13, %c0_14] : memref<8x2x32xf32, #tpu.memory_space<vmem>>, vector<1x2x32xf32>
    %21 = vector.shape_cast %20 : vector<1x2x32xf32> to vector<2x32xf32>
    %22 = vector.shape_cast %18 : vector<2x32xf32> to vector<1x2x32xf32>
    tpu.vector_store %arg6[%19, %c0_13, %c0_14], %22 {strides = array<i32>} : memref<8x2x32xf32, #tpu.memory_space<vmem>>, vector<1x2x32xf32>,
    %23 = arith.cmpi slt, %c0_i32_9, %9 : i32
    %24 = arith.select %23, %18, %10 : vector<2x32xf32>
    %c1_i32 = arith.constant 1 : i32
    %25 = arith.index_cast %c1_i32 : i32 to index
    %c0_15 = arith.constant 0 : index
    %c0_16 = arith.constant 0 : index
    %26 = vector.load %arg2[%25, %c0_15, %c0_16] : memref<8x2x4xf32, #tpu.memory_space<vmem>>, vector<1x2x4xf32>
    %27 = vector.shape_cast %26 : vector<1x2x4xf32> to vector<2x4xf32>
    %cst_17 = arith.constant dense<0.000000e+00> : vector<2x32xf32>
    %28 = tpu.matmul %27, %3, %cst_17 {dimension_numbers = #tpu.dot_dimension_numbers<[1], [0], [0], [1], [0, 0, 1, 1], [], []>} : vector<2x4xf32>, vector<4x32xf32>, vector<2x32xf32> -> vector<2x32xf32>
    %29 = arith.addf %28, %7 : vector<2x32xf32>
    %cst_18 = arith.constant dense<0.000000e+00> : vector<2x32xf32>
    %30 = tpu.matmul %24, %4, %cst_18 {dimension_numbers = #tpu.dot_dimension_numbers<[1], [0], [0], [1], [0, 0, 1, 1], [], []>} : vector<2x32xf32>, vector<32x32xf32>, vector<2x32xf32> -> vector<2x32xf32>
    %31 = arith.addf %29, %30 : vector<2x32xf32>
    %32 = math.tanh %31 : vector<2x32xf32>
    %33 = arith.index_cast %c1_i32 : i32 to index
    %c0_19 = arith.constant 0 : index
    %c0_20 = arith.constant 0 : index
    %34 = vector.load %arg6[%33, %c0_19, %c0_20] : memref<8x2x32xf32, #tpu.memory_space<vmem>>, vector<1x2x32xf32>
    %35 = vector.shape_cast %34 : vector<1x2x32xf32> to vector<2x32xf32>
    %36 = vector.shape_cast %32 : vector<2x32xf32> to vector<1x2x32xf32>
    tpu.vector_store %arg6[%33, %c0_19, %c0_20], %36 {strides = array<i32>} : memref<8x2x32xf32, #tpu.memory_space<vmem>>, vector<1x2x32xf32>,
    %37 = arith.cmpi slt, %c1_i32, %9 : i32
    %38 = arith.select %37, %32, %24 : vector<2x32xf32>
    %c2_i32 = arith.constant 2 : i32
    %39 = arith.index_cast %c2_i32 : i32 to index
    %c0_21 = arith.constant 0 : index
    %c0_22 = arith.constant 0 : index
    %40 = vector.load %arg2[%39, %c0_21, %c0_22] : memref<8x2x4xf32, #tpu.memory_space<vmem>>, vector<1x2x4xf32>
    %41 = vector.shape_cast %40 : vector<1x2x4xf32> to vector<2x4xf32>
    %cst_23 = arith.constant dense<0.000000e+00> : vector<2x32xf32>
    %42 = tpu.matmul %41, %3, %cst_23 {dimension_numbers = #tpu.dot_dimension_numbers<[1], [0], [0], [1], [0, 0, 1, 1], [], []>} : vector<2x4xf32>, vector<4x32xf32>, vector<2x32xf32> -> vector<2x32xf32>
    %43 = arith.addf %42, %7 : vector<2x32xf32>
    %cst_24 = arith.constant dense<0.000000e+00> : vector<2x32xf32>
    %44 = tpu.matmul %38, %4, %cst_24 {dimension_numbers = #tpu.dot_dimension_numbers<[1], [0], [0], [1], [0, 0, 1, 1], [], []>} : vector<2x32xf32>, vector<32x32xf32>, vector<2x32xf32> -> vector<2x32xf32>
    %45 = arith.addf %43, %44 : vector<2x32xf32>
    %46 = math.tanh %45 : vector<2x32xf32>
    %47 = arith.index_cast %c2_i32 : i32 to index
    %c0_25 = arith.constant 0 : index
    %c0_26 = arith.constant 0 : index
    %48 = vector.load %arg6[%47, %c0_25, %c0_26] : memref<8x2x32xf32, #tpu.memory_space<vmem>>, vector<1x2x32xf32>
    %49 = vector.shape_cast %48 : vector<1x2x32xf32> to vector<2x32xf32>
    %50 = vector.shape_cast %46 : vector<2x32xf32> to vector<1x2x32xf32>
    tpu.vector_store %arg6[%47, %c0_25, %c0_26], %50 {strides = array<i32>} : memref<8x2x32xf32, #tpu.memory_space<vmem>>, vector<1x2x32xf32>,
    %51 = arith.cmpi slt, %c2_i32, %9 : i32
    %52 = arith.select %51, %46, %38 : vector<2x32xf32>
    %c3_i32 = arith.constant 3 : i32
    %53 = arith.index_cast %c3_i32 : i32 to index
    %c0_27 = arith.constant 0 : index
    %c0_28 = arith.constant 0 : index
    %54 = vector.load %arg2[%53, %c0_27, %c0_28] : memref<8x2x4xf32, #tpu.memory_space<vmem>>, vector<1x2x4xf32>
    %55 = vector.shape_cast %54 : vector<1x2x4xf32> to vector<2x4xf32>
    %cst_29 = arith.constant dense<0.000000e+00> : vector<2x32xf32>
    %56 = tpu.matmul %55, %3, %cst_29 {dimension_numbers = #tpu.dot_dimension_numbers<[1], [0], [0], [1], [0, 0, 1, 1], [], []>} : vector<2x4xf32>, vector<4x32xf32>, vector<2x32xf32> -> vector<2x32xf32>
    %57 = arith.addf %56, %7 : vector<2x32xf32>
    %cst_30 = arith.constant dense<0.000000e+00> : vector<2x32xf32>
    %58 = tpu.matmul %52, %4, %cst_30 {dimension_numbers = #tpu.dot_dimension_numbers<[1], [0], [0], [1], [0, 0, 1, 1], [], []>} : vector<2x32xf32>, vector<32x32xf32>, vector<2x32xf32> -> vector<2x32xf32>
    %59 = arith.addf %57, %58 : vector<2x32xf32>
    %60 = math.tanh %59 : vector<2x32xf32>
    %61 = arith.index_cast %c3_i32 : i32 to index
    %c0_31 = arith.constant 0 : index
    %c0_32 = arith.constant 0 : index
    %62 = vector.load %arg6[%61, %c0_31, %c0_32] : memref<8x2x32xf32, #tpu.memory_space<vmem>>, vector<1x2x32xf32>
    %63 = vector.shape_cast %62 : vector<1x2x32xf32> to vector<2x32xf32>
    %64 = vector.shape_cast %60 : vector<2x32xf32> to vector<1x2x32xf32>
    tpu.vector_store %arg6[%61, %c0_31, %c0_32], %64 {strides = array<i32>} : memref<8x2x32xf32, #tpu.memory_space<vmem>>, vector<1x2x32xf32>,
    %65 = arith.cmpi slt, %c3_i32, %9 : i32
    %66 = arith.select %65, %60, %52 : vector<2x32xf32>
    %c4_i32 = arith.constant 4 : i32
    %67 = arith.index_cast %c4_i32 : i32 to index
    %c0_33 = arith.constant 0 : index
    %c0_34 = arith.constant 0 : index
    %68 = vector.load %arg2[%67, %c0_33, %c0_34] : memref<8x2x4xf32, #tpu.memory_space<vmem>>, vector<1x2x4xf32>
    %69 = vector.shape_cast %68 : vector<1x2x4xf32> to vector<2x4xf32>
    %cst_35 = arith.constant dense<0.000000e+00> : vector<2x32xf32>
    %70 = tpu.matmul %69, %3, %cst_35 {dimension_numbers = #tpu.dot_dimension_numbers<[1], [0], [0], [1], [0, 0, 1, 1], [], []>} : vector<2x4xf32>, vector<4x32xf32>, vector<2x32xf32> -> vector<2x32xf32>
    %71 = arith.addf %70, %7 : vector<2x32xf32>
    %cst_36 = arith.constant dense<0.000000e+00> : vector<2x32xf32>
    %72 = tpu.matmul %66, %4, %cst_36 {dimension_numbers = #tpu.dot_dimension_numbers<[1], [0], [0], [1], [0, 0, 1, 1], [], []>} : vector<2x32xf32>, vector<32x32xf32>, vector<2x32xf32> -> vector<2x32xf32>
    %73 = arith.addf %71, %72 : vector<2x32xf32>
    %74 = math.tanh %73 : vector<2x32xf32>
    %75 = arith.index_cast %c4_i32 : i32 to index
    %c0_37 = arith.constant 0 : index
    %c0_38 = arith.constant 0 : index
    %76 = vector.load %arg6[%75, %c0_37, %c0_38] : memref<8x2x32xf32, #tpu.memory_space<vmem>>, vector<1x2x32xf32>
    %77 = vector.shape_cast %76 : vector<1x2x32xf32> to vector<2x32xf32>
    %78 = vector.shape_cast %74 : vector<2x32xf32> to vector<1x2x32xf32>
    tpu.vector_store %arg6[%75, %c0_37, %c0_38], %78 {strides = array<i32>} : memref<8x2x32xf32, #tpu.memory_space<vmem>>, vector<1x2x32xf32>,
    %79 = arith.cmpi slt, %c4_i32, %9 : i32
    %80 = arith.select %79, %74, %66 : vector<2x32xf32>
    %c5_i32 = arith.constant 5 : i32
    %81 = arith.index_cast %c5_i32 : i32 to index
    %c0_39 = arith.constant 0 : index
    %c0_40 = arith.constant 0 : index
    %82 = vector.load %arg2[%81, %c0_39, %c0_40] : memref<8x2x4xf32, #tpu.memory_space<vmem>>, vector<1x2x4xf32>
    %83 = vector.shape_cast %82 : vector<1x2x4xf32> to vector<2x4xf32>
    %cst_41 = arith.constant dense<0.000000e+00> : vector<2x32xf32>
    %84 = tpu.matmul %83, %3, %cst_41 {dimension_numbers = #tpu.dot_dimension_numbers<[1], [0], [0], [1], [0, 0, 1, 1], [], []>} : vector<2x4xf32>, vector<4x32xf32>, vector<2x32xf32> -> vector<2x32xf32>
    %85 = arith.addf %84, %7 : vector<2x32xf32>
    %cst_42 = arith.constant dense<0.000000e+00> : vector<2x32xf32>
    %86 = tpu.matmul %80, %4, %cst_42 {dimension_numbers = #tpu.dot_dimension_numbers<[1], [0], [0], [1], [0, 0, 1, 1], [], []>} : vector<2x32xf32>, vector<32x32xf32>, vector<2x32xf32> -> vector<2x32xf32>
    %87 = arith.addf %85, %86 : vector<2x32xf32>
    %88 = math.tanh %87 : vector<2x32xf32>
    %89 = arith.index_cast %c5_i32 : i32 to index
    %c0_43 = arith.constant 0 : index
    %c0_44 = arith.constant 0 : index
    %90 = vector.load %arg6[%89, %c0_43, %c0_44] : memref<8x2x32xf32, #tpu.memory_space<vmem>>, vector<1x2x32xf32>
    %91 = vector.shape_cast %90 : vector<1x2x32xf32> to vector<2x32xf32>
    %92 = vector.shape_cast %88 : vector<2x32xf32> to vector<1x2x32xf32>
    tpu.vector_store %arg6[%89, %c0_43, %c0_44], %92 {strides = array<i32>} : memref<8x2x32xf32, #tpu.memory_space<vmem>>, vector<1x2x32xf32>,
    %93 = arith.cmpi slt, %c5_i32, %9 : i32
    %94 = arith.select %93, %88, %80 : vector<2x32xf32>
    %c6_i32 = arith.constant 6 : i32
    %95 = arith.index_cast %c6_i32 : i32 to index
    %c0_45 = arith.constant 0 : index
    %c0_46 = arith.constant 0 : index
    %96 = vector.load %arg2[%95, %c0_45, %c0_46] : memref<8x2x4xf32, #tpu.memory_space<vmem>>, vector<1x2x4xf32>
    %97 = vector.shape_cast %96 : vector<1x2x4xf32> to vector<2x4xf32>
    %cst_47 = arith.constant dense<0.000000e+00> : vector<2x32xf32>
    %98 = tpu.matmul %97, %3, %cst_47 {dimension_numbers = #tpu.dot_dimension_numbers<[1], [0], [0], [1], [0, 0, 1, 1], [], []>} : vector<2x4xf32>, vector<4x32xf32>, vector<2x32xf32> -> vector<2x32xf32>
    %99 = arith.addf %98, %7 : vector<2x32xf32>
    %cst_48 = arith.constant dense<0.000000e+00> : vector<2x32xf32>
    %100 = tpu.matmul %94, %4, %cst_48 {dimension_numbers = #tpu.dot_dimension_numbers<[1], [0], [0], [1], [0, 0, 1, 1], [], []>} : vector<2x32xf32>, vector<32x32xf32>, vector<2x32xf32> -> vector<2x32xf32>
    %101 = arith.addf %99, %100 : vector<2x32xf32>
    %102 = math.tanh %101 : vector<2x32xf32>
    %103 = arith.index_cast %c6_i32 : i32 to index
    %c0_49 = arith.constant 0 : index
    %c0_50 = arith.constant 0 : index
    %104 = vector.load %arg6[%103, %c0_49, %c0_50] : memref<8x2x32xf32, #tpu.memory_space<vmem>>, vector<1x2x32xf32>
    %105 = vector.shape_cast %104 : vector<1x2x32xf32> to vector<2x32xf32>
    %106 = vector.shape_cast %102 : vector<2x32xf32> to vector<1x2x32xf32>
    tpu.vector_store %arg6[%103, %c0_49, %c0_50], %106 {strides = array<i32>} : memref<8x2x32xf32, #tpu.memory_space<vmem>>, vector<1x2x32xf32>,
    %107 = arith.cmpi slt, %c6_i32, %9 : i32
    %108 = arith.select %107, %102, %94 : vector<2x32xf32>
    %c7_i32 = arith.constant 7 : i32
    %109 = arith.index_cast %c7_i32 : i32 to index
    %c0_51 = arith.constant 0 : index
    %c0_52 = arith.constant 0 : index
    %110 = vector.load %arg2[%109, %c0_51, %c0_52] : memref<8x2x4xf32, #tpu.memory_space<vmem>>, vector<1x2x4xf32>
    %111 = vector.shape_cast %110 : vector<1x2x4xf32> to vector<2x4xf32>
    %cst_53 = arith.constant dense<0.000000e+00> : vector<2x32xf32>
    %112 = tpu.matmul %111, %3, %cst_53 {dimension_numbers = #tpu.dot_dimension_numbers<[1], [0], [0], [1], [0, 0, 1, 1], [], []>} : vector<2x4xf32>, vector<4x32xf32>, vector<2x32xf32> -> vector<2x32xf32>
    %113 = arith.addf %112, %7 : vector<2x32xf32>
    %cst_54 = arith.constant dense<0.000000e+00> : vector<2x32xf32>
    %114 = tpu.matmul %108, %4, %cst_54 {dimension_numbers = #tpu.dot_dimension_numbers<[1], [0], [0], [1], [0, 0, 1, 1], [], []>} : vector<2x32xf32>, vector<32x32xf32>, vector<2x32xf32> -> vector<2x32xf32>
    %115 = arith.addf %113, %114 : vector<2x32xf32>
    %116 = math.tanh %115 : vector<2x32xf32>
    %117 = arith.index_cast %c7_i32 : i32 to index
    %c0_55 = arith.constant 0 : index
    %c0_56 = arith.constant 0 : index
    %118 = vector.load %arg6[%117, %c0_55, %c0_56] : memref<8x2x32xf32, #tpu.memory_space<vmem>>, vector<1x2x32xf32>
    %119 = vector.shape_cast %118 : vector<1x2x32xf32> to vector<2x32xf32>
    %120 = vector.shape_cast %116 : vector<2x32xf32> to vector<1x2x32xf32>
    tpu.vector_store %arg6[%117, %c0_55, %c0_56], %120 {strides = array<i32>} : memref<8x2x32xf32, #tpu.memory_space<vmem>>, vector<1x2x32xf32>,
    %121 = arith.cmpi slt, %c7_i32, %9 : i32
    %122 = arith.select %121, %116, %108 : vector<2x32xf32>
    %c8_i32_57 = arith.constant 8 : i32
    %c0_58 = arith.constant 0 : index
    %c0_59 = arith.constant 0 : index
    %123 = vector.load %arg7[%c0_58, %c0_59] : memref<2x32xf32, #tpu.memory_space<vmem>>, vector<2x32xf32>
    tpu.vector_store %arg7[%c0_58, %c0_59], %122 {strides = array<i32>} : memref<2x32xf32, #tpu.memory_space<vmem>>, vector<2x32xf32>,
    return
  }
  func.func @transform_0(%arg0: i32, %arg1: i32) -> (i32, i32, i32) {
    %c0_i32 = arith.constant 0 : i32
    %c0_i32_0 = arith.constant 0 : i32
    return %arg1, %arg0, %c0_i32 : i32, i32, i32
  }
  func.func @transform_1(%arg0: i32, %arg1: i32) -> (i32, i32) {
    %c0_i32 = arith.constant 0 : i32
    %c0_i32_0 = arith.constant 0 : i32
    %c0_i32_1 = arith.constant 0 : i32
    return %c0_i32, %c0_i32_0 : i32, i32
  }
  func.func @transform_2(%arg0: i32, %arg1: i32) -> (i32, i32) {
    %c0_i32 = arith.constant 0 : i32
    %c0_i32_0 = arith.constant 0 : i32
    %c0_i32_1 = arith.constant 0 : i32
    return %c0_i32, %c0_i32_0 : i32, i32
  }
  func.func @transform_3(%arg0: i32, %arg1: i32) -> (i32, i32) {
    %c0_i32 = arith.constant 0 : i32
    %c0_i32_0 = arith.constant 0 : i32
    %c0_i32_1 = arith.constant 0 : i32
    return %c0_i32, %c0_i32_0 : i32, i32
  }
  func.func @transform_4(%arg0: i32, %arg1: i32) -> (i32, i32, i32) {
    %c0_i32 = arith.constant 0 : i32
    %c0_i32_0 = arith.constant 0 : i32
    return %arg1, %arg0, %c0_i32 : i32, i32, i32
  }
}

</mosaic_0001>

<bundles_post_ra>
// kernel: _rnn_forward_impl.1
= control target key start
LH: loop header
LB: loop body
LE: loop exit
PB: predicated region body
PF: predicated region fallthrough
CT: control target
= control target key end

     0   :  { %vm43_vm0 = vcmask 1043456   ;;  %vm39_vm1 = vcmask 31744   ;;  %v1618_v0 = vmov 0.0   ;;  %vm1619_vm2 = vmmov 0   ;;  %s1843_s1 = inlined_call_operand.vmem [shape: f32[4,32], index: 1, kind: input, shape index: {}]   ;;  %s1844_s0 = inlined_call_operand.vmem [shape: f32[8,2,4], index: 0, kind: input, shape index: {}]   ;;  %s1845_s2 = inlined_call_operand.vmem [shape: f32[32,32], index: 2, kind: input, shape index: {}]   ;;  %s1846_s3 = inlined_call_operand.vmem [shape: f32[1,32], index: 3, kind: input, shape index: {}]   ;;  %s1847_s4 = inlined_call_operand.vmem [shape: f32[8,2,32], index: 4, kind: output, shape index: {}]  }
   0x1   :  { %1399 = vmatprep.subr.mxu0 %v1618_v0  ;;  %v1650_v1 = vld [vmem:[%s1843_s1] sm:$0xf]  ;;  %1401 = vmatprep.mubr.msk.f32.mxu0 %vm1619_vm2, %v1618_v0  ;;  %v25_v4 = vld [vmem:[%s1845_s2 + $0x8] sm:$0xff]  ;;  %v26_v5 = vld [vmem:[%s1845_s2 + $0x10] sm:$0xff]  ;;  %vm21_vm3 = vcmask 254976   ;;  %v1620_v7 = vmov 0.0|0.0  }
   0x2   :  { %v38_v2 = vld [vmem:[%s1844_s0] sm:$0x3]  ;;  %1400 = vmatpush3.msk.msra.mxu0 %vm43_vm0, %v1650_v1  ;;  %v27_v6 = vld [vmem:[%s1845_s2 + $0x18] sm:$0xff]  ;;  %1415 = vmatprep.subr.mxu1 %v1618_v0  ;;  %22 = vst.msk [vmem:[#allocation2] sm:$0x3] %vm21_vm3, %v1618_v0  ;;  %vm117_vm4 = vcmask 261120  }
   0x3   :  { %v24_v3 = vld [vmem:[%s1845_s2] sm:$0xff]  ;;  %1402 = vmatmul.mubr.msk.f32.vlgmr.msra.gmra.mrb[0].mxu0 %vm39_vm1, %v38_v2  ;;  %1527 = vmatprep.subr.bf16.mxu0 %v1620_v7  ;;  %v1683_v9 = vpack.c.bf16 %v27_v6, %v26_v5  ;;  %v1323_v27 = vld [vmem:[%s1844_s0 + $0x8] sm:$0x3]  ;;  %v1328_v32 = vld [vmem:[%s1844_s0 + $0xa] sm:$0x3] }
   0x4   :  { %v1674_v8 = vpack.c.bf16 %v25_v4, %v24_v3  ;;  %1412 = vmatprep.mubr.msk.f32.mxu0 %vm1619_vm2, %v1618_v0  ;;  %1416 = vmatpush3.msk.msra.mxu1 %vm43_vm0, %v1650_v1  ;;  %v1308_v11 = vld [vmem:[%s1844_s0 + $0x2] sm:$0x3]  ;;  %v1710_v12 = vld [vmem:[%s1846_s3] ss:$0 sm:$0xff]  ;;  %v1313_v17 = vld [vmem:[%s1844_s0 + $0x4] sm:$0x3] }
   0x5   :  { %1417 = vmatprep.mubr.msk.f32.mxu1 %vm1619_vm2, %v1618_v0  ;;  %1533 = vmatprep.subr.bf16.mxu1 %v1620_v7  ;;  %v1318_v22 = vld [vmem:[%s1844_s0 + $0x6] sm:$0x3]  ;;  %v1333_v37 = vld [vmem:[%s1844_s0 + $0xc] sm:$0x3]  ;;  %v1338_v42 = vld [vmem:[%s1844_s0 + $0xe] sm:$0x3] }
   0x6   :  { %1529 = vmatpush3.bf16.msra.mxu0 %v1674_v8  ;;  %1418 = vmatmul.mubr.msk.f32.vlgmr.msra.gmra.mrb[0].mxu1 %vm39_vm1, %v1308_v11 }
   0x7   :  { %1530 = vmatprep.subr.bf16.mxu0 %v1620_v7  ;;  %1535 = vmatpush3.bf16.msra.mxu1 %v1674_v8 }
   0x8   :  { %1428 = vmatprep.mubr.msk.f32.mxu1 %vm1619_vm2, %v1618_v0  ;;  %1536 = vmatprep.subr.bf16.mxu1 %v1620_v7 }
   0x9   :  { %v37_v10 = vld [vmem:[#allocation2] sm:$0x3] }
   0xa   :  { %1532 = vmatpush3.bf16.msra.mxu0 %v1683_v9 }
   0xb   :  { %1431 = vmatprep.subr.mxu0 %v1618_v0  ;;  %1538 = vmatpush3.bf16.msra.mxu1 %v1683_v9 }
   0xc   :  { %1447 = vmatprep.subr.mxu1 %v1618_v0 }
   0xd   :  { %1413 = vmatmul.mubr.msk.f32.vlgmr.msra.gmra.mrb[0].mxu0 %vm117_vm4, %v37_v10 }
   0xe   :  { %1432 = vmatpush3.msk.msra.mxu0 %vm43_vm0, %v1650_v1  ;;  %1433 = vmatprep.mubr.msk.f32.mxu0 %vm1619_vm2, %v1618_v0 }
   0xf   :  { %1539 = vmatprep.subr.bf16.mxu0 %v1620_v7 }
  0x11   :  { %1434 = vmatmul.mubr.msk.f32.vlgmr.msra.gmra.mrb[2].mxu0 %vm39_vm1, %v1313_v17 }
  0x12   :  { %1541 = vmatpush3.bf16.msra.mxu0 %v1674_v8  ;;  %1444 = vmatprep.mubr.msk.f32.mxu0 %vm1619_vm2, %v1618_v0 }
  0x13   :  { %1542 = vmatprep.subr.bf16.mxu0 %v1620_v7 }
  0x16   :  { %1544 = vmatpush3.bf16.msra.mxu0 %v1683_v9 }
  0x17   :  { %1463 = vmatprep.subr.mxu0 %v1618_v0 }
  0xe0   :  { %v187_v13 = vpop.f32.mrb[0].mxu0 }
  0xe1   :  { %v1575_v14 = vadd.f32 %v1710_v12, %v187_v13  ;;  %v1414_v15 = vpop.f32.mrb[1].mxu0 }
  0xe3   :  { %1602 = vtanh.f32 %v1575_v14 }
  0xed   :  { %v1603_v16 = vpop.eup %1602 }
  0xee   :  { %194 = vst.msk [vmem:[%s1847_s4] sm:$0x3] %vm21_vm3, %v1603_v16  ;;  %1429 = vmatmul.mubr.msk.f32.vlgmr.msra.gmra.mrb[0].mxu1 %vm117_vm4, %v1603_v16 }
  0xef   :  { %1448 = vmatpush3.msk.msra.mxu1 %vm43_vm0, %v1650_v1  ;;  %1449 = vmatprep.mubr.msk.f32.mxu1 %vm1619_vm2, %v1618_v0 }
  0xf0   :  { %1545 = vmatprep.subr.bf16.mxu1 %v1620_v7 }
  0xf2   :  { %1450 = vmatmul.mubr.msk.f32.vlgmr.msra.gmra.mrb[2].mxu1 %vm39_vm1, %v1318_v22 }
  0xf3   :  { %1547 = vmatpush3.bf16.msra.mxu1 %v1674_v8  ;;  %1460 = vmatprep.mubr.msk.f32.mxu1 %vm1619_vm2, %v1618_v0 }
  0xf4   :  { %1548 = vmatprep.subr.bf16.mxu1 %v1620_v7 }
  0xf7   :  { %1550 = vmatpush3.bf16.msra.mxu1 %v1683_v9 }
  0xf8   :  { %1479 = vmatprep.subr.mxu1 %v1618_v0 }
 0x1c1   :  { %v344_v18 = vpop.f32.mrb[0].mxu1 }
 0x1c2   :  { %v1576_v19 = vadd.f32 %v1710_v12, %v344_v18  ;;  %v1430_v20 = vpop.f32.mrb[1].mxu1 }
 0x1c4   :  { %1604 = vtanh.f32 %v1576_v19 }
 0x1ce   :  { %v1605_v21 = vpop.eup %1604 }
 0x1cf   :  { %1312 = vst.msk [vmem:[%s1847_s4 + $0x2] sm:$0x3] %vm21_vm3, %v1605_v21  ;;  %1445 = vmatmul.mubr.msk.f32.vlgmr.msra.gmra.mrb[2].mxu0 %vm117_vm4, %v1605_v21 }
 0x1d0   :  { %1464 = vmatpush3.msk.msra.mxu0 %vm43_vm0, %v1650_v1  ;;  %1465 = vmatprep.mubr.msk.f32.mxu0 %vm1619_vm2, %v1618_v0 }
 0x1d1   :  { %1551 = vmatprep.subr.bf16.mxu0 %v1620_v7 }
 0x1d3   :  { %1466 = vmatmul.mubr.msk.f32.vlgmr.msra.gmra.mrb[4].mxu0 %vm39_vm1, %v1323_v27 }
 0x1d4   :  { %1553 = vmatpush3.bf16.msra.mxu0 %v1674_v8  ;;  %1476 = vmatprep.mubr.msk.f32.mxu0 %vm1619_vm2, %v1618_v0 }
 0x1d5   :  { %1554 = vmatprep.subr.bf16.mxu0 %v1620_v7 }
 0x1d8   :  { %1556 = vmatpush3.bf16.msra.mxu0 %v1683_v9 }
 0x1d9   :  { %1495 = vmatprep.subr.mxu0 %v1618_v0 }
 0x2a2   :  { %v501_v23 = vpop.f32.mrb[2].mxu0 }
 0x2a3   :  { %v1577_v24 = vadd.f32 %v1710_v12, %v501_v23  ;;  %v1446_v25 = vpop.f32.mrb[3].mxu0 }
 0x2a5   :  { %1606 = vtanh.f32 %v1577_v24 }
 0x2af   :  { %v1607_v26 = vpop.eup %1606 }
 0x2b0   :  { %1317 = vst.msk [vmem:[%s1847_s4 + $0x4] sm:$0x3] %vm21_vm3, %v1607_v26  ;;  %1461 = vmatmul.mubr.msk.f32.vlgmr.msra.gmra.mrb[2].mxu1 %vm117_vm4, %v1607_v26 }
 0x2b1   :  { %1480 = vmatpush3.msk.msra.mxu1 %vm43_vm0, %v1650_v1  ;;  %1481 = vmatprep.mubr.msk.f32.mxu1 %vm1619_vm2, %v1618_v0 }
 0x2b2   :  { %1557 = vmatprep.subr.bf16.mxu1 %v1620_v7 }
 0x2b4   :  { %1482 = vmatmul.mubr.msk.f32.vlgmr.msra.gmra.mrb[4].mxu1 %vm39_vm1, %v1328_v32 }
 0x2b5   :  { %1559 = vmatpush3.bf16.msra.mxu1 %v1674_v8  ;;  %1492 = vmatprep.mubr.msk.f32.mxu1 %vm1619_vm2, %v1618_v0 }
 0x2b6   :  { %1560 = vmatprep.subr.bf16.mxu1 %v1620_v7 }
 0x2b9   :  { %1562 = vmatpush3.bf16.msra.mxu1 %v1683_v9 }
 0x2ba   :  { %1511 = vmatprep.subr.mxu1 %v1618_v0 }
 0x383   :  { %v658_v28 = vpop.f32.mrb[2].mxu1 }
 0x384   :  { %v1578_v29 = vadd.f32 %v1710_v12, %v658_v28  ;;  %v1462_v30 = vpop.f32.mrb[3].mxu1 }
 0x386   :  { %1608 = vtanh.f32 %v1578_v29 }
 0x390   :  { %v1609_v31 = vpop.eup %1608 }
 0x391   :  { %1322 = vst.msk [vmem:[%s1847_s4 + $0x6] sm:$0x3] %vm21_vm3, %v1609_v31  ;;  %1477 = vmatmul.mubr.msk.f32.vlgmr.msra.gmra.mrb[4].mxu0 %vm117_vm4, %v1609_v31 }
 0x392   :  { %1496 = vmatpush3.msk.msra.mxu0 %vm43_vm0, %v1650_v1  ;;  %1497 = vmatprep.mubr.msk.f32.mxu0 %vm1619_vm2, %v1618_v0 }
 0x393   :  { %1563 = vmatprep.subr.bf16.mxu0 %v1620_v7 }
 0x395   :  { %1498 = vmatmul.mubr.msk.f32.vlgmr.msra.gmra.mrb[6].mxu0 %vm39_vm1, %v1333_v37 }
 0x396   :  { %1565 = vmatpush3.bf16.msra.mxu0 %v1674_v8  ;;  %1508 = vmatprep.mubr.msk.f32.mxu0 %vm1619_vm2, %v1618_v0 }
 0x397   :  { %1566 = vmatprep.subr.bf16.mxu0 %v1620_v7 }
 0x39a   :  { %1568 = vmatpush3.bf16.msra.mxu0 %v1683_v9 }
 0x464   :  { %v815_v33 = vpop.f32.mrb[4].mxu0 }
 0x465   :  { %v1579_v34 = vadd.f32 %v1710_v12, %v815_v33  ;;  %v1478_v35 = vpop.f32.mrb[5].mxu0 }
 0x467   :  { %1610 = vtanh.f32 %v1579_v34 }
 0x471   :  { %v1611_v36 = vpop.eup %1610 }
 0x472   :  { %1327 = vst.msk [vmem:[%s1847_s4 + $0x8] sm:$0x3] %vm21_vm3, %v1611_v36  ;;  %1493 = vmatmul.mubr.msk.f32.vlgmr.msra.gmra.mrb[4].mxu1 %vm117_vm4, %v1611_v36 }
 0x473   :  { %1512 = vmatpush3.msk.msra.mxu1 %vm43_vm0, %v1650_v1  ;;  %1513 = vmatprep.mubr.msk.f32.mxu1 %vm1619_vm2, %v1618_v0 }
 0x474   :  { %1569 = vmatprep.subr.bf16.mxu1 %v1620_v7 }
 0x476   :  { %1514 = vmatmul.mubr.msk.f32.vlgmr.msra.gmra.mrb[6].mxu1 %vm39_vm1, %v1338_v42 }
 0x477   :  { %1571 = vmatpush3.bf16.msra.mxu1 %v1674_v8  ;;  %1524 = vmatprep.mubr.msk.f32.mxu1 %vm1619_vm2, %v1618_v0 }
 0x478   :  { %1572 = vmatprep.subr.bf16.mxu1 %v1620_v7 }
 0x47b   :  { %1574 = vmatpush3.bf16.msra.mxu1 %v1683_v9 }
 0x545   :  { %v972_v38 = vpop.f32.mrb[4].mxu1 }
 0x546   :  { %v1580_v39 = vadd.f32 %v1710_v12, %v972_v38  ;;  %v1494_v40 = vpop.f32.mrb[5].mxu1 }
 0x548   :  { %1612 = vtanh.f32 %v1580_v39 }
 0x552   :  { %v1613_v41 = vpop.eup %1612 }
 0x553   :  { %1332 = vst.msk [vmem:[%s1847_s4 + $0xa] sm:$0x3] %vm21_vm3, %v1613_v41  ;;  %1509 = vmatmul.mubr.msk.f32.vlgmr.msra.gmra.mrb[6].mxu0 %vm117_vm4, %v1613_v41 }
 0x626   :  { %v1129_v43 = vpop.f32.mrb[6].mxu0 }
 0x627   :  { %v1581_v44 = vadd.f32 %v1710_v12, %v1129_v43  ;;  %v1510_v45 = vpop.f32.mrb[7].mxu0 }
 0x629   :  { %1614 = vtanh.f32 %v1581_v44 }
 0x633   :  { %v1615_v46 = vpop.eup %1614 }
 0x634   :  { %1337 = vst.msk [vmem:[%s1847_s4 + $0xc] sm:$0x3] %vm21_vm3, %v1615_v46  ;;  %1525 = vmatmul.mubr.msk.f32.vlgmr.msra.gmra.mrb[6].mxu1 %vm117_vm4, %v1615_v46 }
 0x707   :  { %v1286_v47 = vpop.f32.mrb[6].mxu1 }
 0x708   :  { %v1582_v48 = vadd.f32 %v1710_v12, %v1286_v47  ;;  %v1526_v49 = vpop.f32.mrb[7].mxu1 }
 0x70a   :  { %1616 = vtanh.f32 %v1582_v48 }
 0x714   :  { %v1617_v50 = vpop.eup %1616 }
 0x715   :  { %1342 = vst.msk [vmem:[%s1847_s4 + $0xe] sm:$0x3] %vm21_vm3, %v1617_v50  ;;  %1299 = vst.msk [vmem:[#allocation2] sm:$0x3] %vm21_vm3, %v1617_v50 }

</bundles_post_ra>
